<compile_context>
chip_gen: v5e
topology: v5e:2x2
jax: 0.10.0
libtpu: 0.0.40
codegen_flags: <defaults>
</compile_context>

<pallas_src>
import functools

import jax
import jax.numpy as jnp
from jax import lax
from jax.experimental import pallas as pl
from jax.experimental.pallas import tpu as pltpu

M_EMA = 0.999
T_MOCO = 0.07
EPS = 1e-12

_V5E_SOFT_VMEM = 12 * 1024 * 1024      # stay inside v5e's 16 MiB scoped-VMEM default
_V7X_VMEM_CEIL = 48 * 1024 * 1024      # headroom under v7x's 64 MiB physical VMEM


def _round_up(x, m):
    return ((x + m - 1) // m) * m


def _l2_normalize_rows(x):
    # multiply-by-rsqrt (EUP slot) instead of divide-by-norm (VPU chain).
    # Clamping the squared sum at EPS^2 preserves x / max(||x||, EPS) semantics.
    ss = jnp.sum(x * x, axis=1, keepdims=True)
    inv = lax.rsqrt(jnp.maximum(ss, EPS * EPS))
    return x * inv


def _vmem_bytes_estimate(n, d_in, hid, c, ncls, tk):
    """Rough VMEM footprint (bytes): resident blocks (x2 for pipeline buffers)
    plus the double-buffered bank / l_neg tiles."""
    f32, bf16 = 4, 2
    nparam = (d_in * hid + hid) + (hid * c + c) + (c * ncls + ncls)
    resident = (
        2 * n * d_in * f32                        # im_q, im_k
        + 3 * nparam * f32                        # src + momentum(in) + momentum(out)
        + (n * c + n * ncls + n * c + n) * f32    # feats_q, logits_q, k, l_pos
        + n * c * bf16                            # q scratch (bf16)
    )
    tiles = 2 * c * tk * bf16 + 2 * n * tk * f32  # double-buffered bank + l_neg tiles
    return 2 * resident + tiles


# ---------------------------------------------------------------------------
# Fused kernel: encoder + EMA + l_pos on grid step 0, l_neg tile every step.
# ---------------------------------------------------------------------------
def adamoco_fused_kernel(
    # inputs
    imq_ref, imk_ref,
    wf_ref, bf_ref, wb_ref, bb_ref, wc_ref, bc_ref,            # src_model params
    wfm_ref, bfm_ref, wbm_ref, bbm_ref, wcm_ref, bcm_ref,       # momentum params (pre-update)
    bank_ref,                                                   # bf16 bank tile (C, tk)
    # outputs
    feats_q_ref, logits_q_ref, k_ref, l_pos_ref, l_neg_ref,
    wfm_o, bfm_o, wbm_o, bbm_o, wcm_o, bcm_o,                   # updated momentum params
    # scratch
    q_bf16,                                                     # (N, C) bf16, persists across grid
):
    @pl.when(pl.program_id(0) == 0)
    def _encoder_ema_and_lpos():
        # ---- q branch: feats_q = netB(netF(im_q)); logits_q = netC(feats_q) ----
        h_q = jnp.dot(imq_ref[...], wf_ref[...], preferred_element_type=jnp.float32)
        h_q = jnp.maximum(h_q + bf_ref[...], 0.0)                               # netF (Linear+ReLU)
        feats_q = jnp.dot(h_q, wb_ref[...], preferred_element_type=jnp.float32) + bb_ref[...]  # netB
        feats_q_ref[...] = feats_q
        logits_q_ref[...] = (
            jnp.dot(feats_q, wc_ref[...], preferred_element_type=jnp.float32) + bc_ref[...]    # netC
        )

        q = _l2_normalize_rows(feats_q)                                         # F.normalize(dim=1)
        q_bf16[...] = q.astype(jnp.bfloat16)                                    # feeds the l_neg tiles

        # ---- momentum update (param_k = m*param_k + (1-m)*param_q), in place ----
        wfm_new = wfm_ref[...] * M_EMA + wf_ref[...] * (1.0 - M_EMA)
        bfm_new = bfm_ref[...] * M_EMA + bf_ref[...] * (1.0 - M_EMA)
        wbm_new = wbm_ref[...] * M_EMA + wb_ref[...] * (1.0 - M_EMA)
        bbm_new = bbm_ref[...] * M_EMA + bb_ref[...] * (1.0 - M_EMA)
        wcm_new = wcm_ref[...] * M_EMA + wc_ref[...] * (1.0 - M_EMA)
        bcm_new = bcm_ref[...] * M_EMA + bc_ref[...] * (1.0 - M_EMA)
        wfm_o[...] = wfm_new
        bfm_o[...] = bfm_new
        wbm_o[...] = wbm_new
        bbm_o[...] = bbm_new
        wcm_o[...] = wcm_new
        bcm_o[...] = bcm_new

        # ---- k branch (no_grad): k = normalize(netB_m(netF_m(im_k)), dim=1) ----
        h_k = jnp.dot(imk_ref[...], wfm_new, preferred_element_type=jnp.float32)
        h_k = jnp.maximum(h_k + bfm_new, 0.0)
        feats_k = jnp.dot(h_k, wbm_new, preferred_element_type=jnp.float32) + bbm_new
        k = _l2_normalize_rows(feats_k)
        k_ref[...] = k

        # l_pos already scaled by 1/T (tiny [N,1] store)
        l_pos_ref[...] = jnp.sum(q * k, axis=1, keepdims=True) * (1.0 / T_MOCO)

    # ---- every grid step: one lane-dense [N, tk] tile of l_neg / T ----
    l_neg_ref[...] = (
        jnp.dot(q_bf16[...], bank_ref[...], preferred_element_type=jnp.float32)
        * (1.0 / T_MOCO)
    )


@functools.partial(jax.jit, static_argnames=("tk",), donate_argnums=(3,))
def adamoco_forward(im_q, im_k, src_params, mom_params, bank_bf16, *, tk=2048):
    (wf, bf, wb, bb, wc, bc) = src_params
    (wfm, bfm, wbm, bbm, wcm, bcm) = mom_params
    assert bank_bf16.dtype == jnp.bfloat16, "keep the memory bank resident in bf16"

    N, d_in = im_q.shape
    hid = wf.shape[1]
    C = wb.shape[1]                      # features_length
    ncls = wc.shape[1]
    K = bank_bf16.shape[1]
    f32 = jnp.float32

    # K tile: multiple of 128, no larger than (padded) K, capped so the
    # double-buffered bank + l_neg tiles fit v5e's scoped-VMEM default.
    tk = max(128, min(_round_up(tk, 128), _round_up(K, 128)))
    per_lane = 2 * (C * 2 + N * 4)
    resident = _vmem_bytes_estimate(N, d_in, hid, C, ncls, 0)
    tile_budget = max(1 << 20, _V5E_SOFT_VMEM - resident)
    tk_cap = max(128, (tile_budget // per_lane) // 128 * 128)
    tk = min(tk, tk_cap)

    est = _vmem_bytes_estimate(N, d_in, hid, C, ncls, tk)
    assert est <= _V7X_VMEM_CEIL, (
        f"VMEM estimate {est / 2**20:.1f} MiB exceeds v7x budget; tile the encoder weights")

    num_tiles = pl.cdiv(K, tk)           # ragged last tile is masked by Pallas (no jnp.pad)

    def pinned(shape):
        return pl.BlockSpec(shape, lambda j: (0,) * len(shape))

    in_specs = [
        pinned(im_q.shape), pinned(im_k.shape),
        pinned(wf.shape), pinned(bf.shape), pinned(wb.shape), pinned(bb.shape),
        pinned(wc.shape), pinned(bc.shape),
        pinned(wfm.shape), pinned(bfm.shape), pinned(wbm.shape), pinned(bbm.shape),
        pinned(wcm.shape), pinned(bcm.shape),
        # bank tile: pipelined DMA over K. Default double-buffering; bump to
        # pipeline_mode=pl.Buffered(3) only if the trace still shows exposed DMA.
        pl.BlockSpec((C, tk), lambda j: (0, j)),
    ]

    out_shape = (
        jax.ShapeDtypeStruct((N, C), f32),               # feats_q
        jax.ShapeDtypeStruct((N, ncls), f32),            # logits_q
        jax.ShapeDtypeStruct((N, C), f32),               # k
        jax.ShapeDtypeStruct((N, 1), f32),               # l_pos / T
        # TODO(synk): emit bf16 here if the downstream contrastive loss tolerates it
        jax.ShapeDtypeStruct((N, K), f32),               # l_neg / T
        jax.ShapeDtypeStruct(wfm.shape, f32),
        jax.ShapeDtypeStruct(bfm.shape, f32),
        jax.ShapeDtypeStruct(wbm.shape, f32),
        jax.ShapeDtypeStruct(bbm.shape, f32),
        jax.ShapeDtypeStruct(wcm.shape, f32),
        jax.ShapeDtypeStruct(bcm.shape, f32),
    )
    out_specs = (
        pinned((N, C)), pinned((N, ncls)), pinned((N, C)), pinned((N, 1)),
        pl.BlockSpec((N, tk), lambda j: (0, j)),          # lane-dense l_neg tiles
        pinned(wfm.shape), pinned(bfm.shape), pinned(wbm.shape),
        pinned(bbm.shape), pinned(wcm.shape), pinned(bcm.shape),
    )

    cp_kwargs = dict(dimension_semantics=("arbitrary",))  # q carried in scratch across K tiles
    if est > _V5E_SOFT_VMEM:
        cp_kwargs["vmem_limit_bytes"] = int(min(est + est // 4, _V7X_VMEM_CEIL))

    outs = pl.pallas_call(
        adamoco_fused_kernel,
        out_shape=out_shape,
        grid_spec=pltpu.PrefetchScalarGridSpec(
            num_scalar_prefetch=0,
            grid=(num_tiles,),
            in_specs=in_specs,
            out_specs=out_specs,
            scratch_shapes=[pltpu.VMEM((N, C), jnp.bfloat16)],
        ),
        # EMA update is semantically in-place on the momentum params
        # (combined with jit donate_argnums above, no defensive copies).
        input_output_aliases={8: 5, 9: 6, 10: 7, 11: 8, 12: 9, 13: 10},
        compiler_params=pltpu.CompilerParams(**cp_kwargs),
    )(im_q, im_k, wf, bf, wb, bb, wc, bc, wfm, bfm, wbm, bbm, wcm, bcm, bank_bf16)

    (feats_q, logits_q, k_out, l_pos, l_neg,
     wfm_n, bfm_n, wbm_n, bbm_n, wcm_n, bcm_n) = outs

    # 1-column concat done in XLA so the kernel's [N, K] stores stay lane-aligned.
    logits_ins = jnp.concatenate([l_pos, l_neg], axis=1)

    mom_new = (wfm_n, bfm_n, wbm_n, bbm_n, wcm_n, bcm_n)
    return feats_q, logits_q, logits_ins, k_out, mom_new


def adamoco_reference(im_q, im_k, src_params, mom_params, features_bank):
    """Pure-JAX reference mirroring AdaMoCo.forward semantics (f32 bank)."""
    (wf, bf, wb, bb, wc, bc) = src_params

    h_q = jnp.maximum(im_q @ wf + bf, 0.0)
    feats_q = h_q @ wb + bb
    logits_q = feats_q @ wc + bc
    q = feats_q / jnp.maximum(jnp.linalg.norm(feats_q, axis=1, keepdims=True), EPS)

    mom_new = tuple(pk * M_EMA + pq * (1.0 - M_EMA)
                    for pk, pq in zip(mom_params, src_params))
    (wfm_n, bfm_n, wbm_n, bbm_n, _wcm_n, _bcm_n) = mom_new

    h_k = jnp.maximum(im_k @ wfm_n + bfm_n, 0.0)
    feats_k = h_k @ wbm_n + bbm_n
    k = feats_k / jnp.maximum(jnp.linalg.norm(feats_k, axis=1, keepdims=True), EPS)

    l_pos = jnp.sum(q * k, axis=1, keepdims=True)
    l_neg = q @ features_bank
    logits_ins = jnp.concatenate([l_pos, l_neg], axis=1) / T_MOCO
    return feats_q, logits_q, logits_ins, k, mom_new


if __name__ == "__main__":
    # Small, module-consistent sizes.
    N = 8                 # batch
    D_IN = 32             # flattened input dim consumed by netF
    HID = 64              # netF output dim
    C = 32                # features_length (netB output)
    NUM_CLASSES = 16
    DATASET_LEN = 1000
    K = min(16384, DATASET_LEN)   # 1000 -> exercises the ragged (masked) last K tile

    key = jax.random.PRNGKey(0)
    ks = jax.random.split(key, 16)

    im_q = jax.random.normal(ks[0], (N, D_IN), jnp.float32)
    im_k = jax.random.normal(ks[1], (N, D_IN), jnp.float32)

    def lin(kw, kb, din, dout):
        w = jax.random.normal(kw, (din, dout), jnp.float32) * (1.0 / jnp.sqrt(din))
        b = jax.random.normal(kb, (1, dout), jnp.float32) * 0.01
        return w, b

    wf, bf = lin(ks[2], ks[3], D_IN, HID)           # netF
    wb, bb = lin(ks[4], ks[5], HID, C)              # netB
    wc, bc = lin(ks[6], ks[7], C, NUM_CLASSES)      # netC
    wfm, bfm = lin(ks[8], ks[9], D_IN, HID)         # momentum netF
    wbm, bbm = lin(ks[10], ks[11], HID, C)          # momentum netB
    wcm, bcm = lin(ks[12], ks[13], C, NUM_CLASSES)  # momentum netC

    # register_buffer('features', randn(features_length, K)); F.normalize(dim=0).
    feat_bank = jax.random.normal(ks[14], (C, K), jnp.float32)
    feat_bank = feat_bank / jnp.maximum(jnp.linalg.norm(feat_bank, axis=0, keepdims=True), EPS)
    # Persist the memory bank in bf16 (done ONCE, like a register_buffer you own).
    bank_bf16 = feat_bank.astype(jnp.bfloat16)
    # TODO(synk): labels / idxs / mem_labels buffers, update_memory(), cls_only early-return
    # and the 'image' dset branch (netF-only + masking_layer) are host-side bookkeeping /
    # alternate configs not exercised by this forward path; not ported.

    src_params = (wf, bf, wb, bb, wc, bc)
    mom_params = (wfm, bfm, wbm, bbm, wcm, bcm)

    # Compute the reference first (momentum params are donated/aliased in place by the kernel call).
    ref = adamoco_reference(im_q, im_k, src_params, mom_params, feat_bank)
    r_feats, r_logits, r_logits_ins, r_k, r_mom = ref

    # tk=256 at this small K exercises a multi-step grid + the masked ragged tile.
    outs = adamoco_forward(im_q, im_k, src_params, mom_params, bank_bf16, tk=256)
    outs = jax.block_until_ready(outs)
    feats_q, logits_q, logits_ins, k_out, mom_new = outs

    # Correctness checks.
    for name, got, want in (("feats_q", feats_q, r_feats),
                            ("logits_q", logits_q, r_logits),
                            ("k", k_out, r_k)):
        assert got.shape == want.shape and got.dtype == want.dtype, name
        assert jnp.allclose(got, want, rtol=2e-2, atol=2e-2), f"{name} mismatch vs reference"

    assert logits_ins.shape == r_logits_ins.shape and logits_ins.dtype == r_logits_ins.dtype
    # l_neg uses a bf16 bank + bf16 q on the MXU (f32 accumulate); /T=14.3 scale,
    # so use a slightly looser absolute tolerance.
    assert jnp.allclose(logits_ins, r_logits_ins, rtol=2e-2, atol=1e-1), "logits_ins mismatch"

    for got, want in zip(mom_new, r_mom):
        assert got.shape == want.shape
        assert jnp.allclose(got, want, rtol=1e-5, atol=1e-5), "momentum param mismatch"

    print("KERNEL_OK")
</pallas_src>

<mosaic_0001>
module attributes {stable_mosaic.version = 11 : i64} {
  func.func @adamoco_fused_kernel(%arg0: i32, %arg1: memref<8x32xf32, #tpu.memory_space<vmem>>, %arg2: memref<8x32xf32, #tpu.memory_space<vmem>>, %arg3: memref<32x64xf32, #tpu.memory_space<vmem>>, %arg4: memref<1x64xf32, #tpu.memory_space<vmem>>, %arg5: memref<64x32xf32, #tpu.memory_space<vmem>>, %arg6: memref<1x32xf32, #tpu.memory_space<vmem>>, %arg7: memref<32x16xf32, #tpu.memory_space<vmem>>, %arg8: memref<1x16xf32, #tpu.memory_space<vmem>>, %arg9: memref<32x64xf32, #tpu.memory_space<vmem>>, %arg10: memref<1x64xf32, #tpu.memory_space<vmem>>, %arg11: memref<64x32xf32, #tpu.memory_space<vmem>>, %arg12: memref<1x32xf32, #tpu.memory_space<vmem>>, %arg13: memref<32x16xf32, #tpu.memory_space<vmem>>, %arg14: memref<1x16xf32, #tpu.memory_space<vmem>>, %arg15: memref<32x256xbf16, #tpu.memory_space<vmem>>, %arg16: memref<8x32xf32, #tpu.memory_space<vmem>>, %arg17: memref<8x16xf32, #tpu.memory_space<vmem>>, %arg18: memref<8x32xf32, #tpu.memory_space<vmem>>, %arg19: memref<8x1xf32, #tpu.memory_space<vmem>>, %arg20: memref<8x256xf32, #tpu.memory_space<vmem>>, %arg21: memref<32x64xf32, #tpu.memory_space<vmem>>, %arg22: memref<1x64xf32, #tpu.memory_space<vmem>>, %arg23: memref<64x32xf32, #tpu.memory_space<vmem>>, %arg24: memref<1x32xf32, #tpu.memory_space<vmem>>, %arg25: memref<32x16xf32, #tpu.memory_space<vmem>>, %arg26: memref<1x16xf32, #tpu.memory_space<vmem>>, %arg27: memref<8x32xbf16, #tpu.memory_space<vmem>>) attributes {dimension_semantics = [#tpu.dimension_semantics<arbitrary>], iteration_bounds = array<i64: 4>, scalar_prefetch = 0 : i64, scratch_operands = 1 : i64, tpu.core_type = #tpu.core_type<tc>, window_params = [{pipeline_mode = #tpu.pipeline_mode<synchronous>, transform_indices = @transform_0, window_bounds = array<i64: 8, 32>}, {pipeline_mode = #tpu.pipeline_mode<synchronous>, transform_indices = @transform_1, window_bounds = array<i64: 8, 32>}, {pipeline_mode = #tpu.pipeline_mode<synchronous>, transform_indices = @transform_2, window_bounds = array<i64: 32, 64>}, {pipeline_mode = #tpu.pipeline_mode<synchronous>, transform_indices = @transform_3, window_bounds = array<i64: 1, 64>}, {pipeline_mode = #tpu.pipeline_mode<synchronous>, transform_indices = @transform_4, window_bounds = array<i64: 64, 32>}, {pipeline_mode = #tpu.pipeline_mode<synchronous>, transform_indices = @transform_5, window_bounds = array<i64: 1, 32>}, {pipeline_mode = #tpu.pipeline_mode<synchronous>, transform_indices = @transform_6, window_bounds = array<i64: 32, 16>}, {pipeline_mode = #tpu.pipeline_mode<synchronous>, transform_indices = @transform_7, window_bounds = array<i64: 1, 16>}, {pipeline_mode = #tpu.pipeline_mode<synchronous>, transform_indices = @transform_8, window_bounds = array<i64: 32, 64>}, {pipeline_mode = #tpu.pipeline_mode<synchronous>, transform_indices = @transform_9, window_bounds = array<i64: 1, 64>}, {pipeline_mode = #tpu.pipeline_mode<synchronous>, transform_indices = @transform_10, window_bounds = array<i64: 64, 32>}, {pipeline_mode = #tpu.pipeline_mode<synchronous>, transform_indices = @transform_11, window_bounds = array<i64: 1, 32>}, {pipeline_mode = #tpu.pipeline_mode<synchronous>, transform_indices = @transform_12, window_bounds = array<i64: 32, 16>}, {pipeline_mode = #tpu.pipeline_mode<synchronous>, transform_indices = @transform_13, window_bounds = array<i64: 1, 16>}, {transform_indices = @transform_14, window_bounds = array<i64: 32, 256>}, {pipeline_mode = #tpu.pipeline_mode<synchronous>, transform_indices = @transform_15, window_bounds = array<i64: 8, 32>}, {pipeline_mode = #tpu.pipeline_mode<synchronous>, transform_indices = @transform_16, window_bounds = array<i64: 8, 16>}, {pipeline_mode = #tpu.pipeline_mode<synchronous>, transform_indices = @transform_17, window_bounds = array<i64: 8, 32>}, {pipeline_mode = #tpu.pipeline_mode<synchronous>, transform_indices = @transform_18, window_bounds = array<i64: 8, 1>}, {transform_indices = @transform_19, window_bounds = array<i64: 8, 256>}, {pipeline_mode = #tpu.pipeline_mode<synchronous>, transform_indices = @transform_20, window_bounds = array<i64: 32, 64>}, {pipeline_mode = #tpu.pipeline_mode<synchronous>, transform_indices = @transform_21, window_bounds = array<i64: 1, 64>}, {pipeline_mode = #tpu.pipeline_mode<synchronous>, transform_indices = @transform_22, window_bounds = array<i64: 64, 32>}, {pipeline_mode = #tpu.pipeline_mode<synchronous>, transform_indices = @transform_23, window_bounds = array<i64: 1, 32>}, {pipeline_mode = #tpu.pipeline_mode<synchronous>, transform_indices = @transform_24, window_bounds = array<i64: 32, 16>}, {pipeline_mode = #tpu.pipeline_mode<synchronous>, transform_indices = @transform_25, window_bounds = array<i64: 1, 16>}]} {
    %c0_i32 = arith.constant 0 : i32
    %0 = arith.cmpi eq, %arg0, %c0_i32 : i32
    %1 = arith.extui %0 : i1 to i32
    %c0_i32_0 = arith.constant 0 : i32
    %2 = arith.cmpi ne, %1, %c0_i32_0 : i32
    scf.if %2 {
      %c0_7 = arith.constant 0 : index
      %c0_8 = arith.constant 0 : index
      %9 = vector.load %arg1[%c0_7, %c0_8] : memref<8x32xf32, #tpu.memory_space<vmem>>, vector<8x32xf32>
      %c0_9 = arith.constant 0 : index
      %c0_10 = arith.constant 0 : index
      %10 = vector.load %arg3[%c0_9, %c0_10] : memref<32x64xf32, #tpu.memory_space<vmem>>, vector<32x64xf32>
      %cst_11 = arith.constant dense<0.000000e+00> : vector<8x64xf32>
      %11 = tpu.matmul %9, %10, %cst_11 {dimension_numbers = #tpu.dot_dimension_numbers<[1], [0], [0], [1], [0, 0, 1, 1], [], []>} : vector<8x32xf32>, vector<32x64xf32>, vector<8x64xf32> -> vector<8x64xf32>
      %c0_12 = arith.constant 0 : index
      %c0_13 = arith.constant 0 : index
      %12 = vector.load %arg4[%c0_12, %c0_13] : memref<1x64xf32, #tpu.memory_space<vmem>>, vector<1x64xf32>
      %13 = vector.broadcast %12 : vector<1x64xf32> to vector<8x64xf32>
      %14 = arith.addf %11, %13 : vector<8x64xf32>
      %cst_14 = arith.constant 0.000000e+00 : f32
      %15 = vector.broadcast %cst_14 : f32 to vector<8x64xf32>
      %16 = arith.maximumf %14, %15 : vector<8x64xf32>
      %c0_15 = arith.constant 0 : index
      %c0_16 = arith.constant 0 : index
      %17 = vector.load %arg5[%c0_15, %c0_16] : memref<64x32xf32, #tpu.memory_space<vmem>>, vector<64x32xf32>
      %cst_17 = arith.constant dense<0.000000e+00> : vector<8x32xf32>
      %18 = tpu.matmul %16, %17, %cst_17 {dimension_numbers = #tpu.dot_dimension_numbers<[1], [0], [0], [1], [0, 0, 1, 1], [], []>} : vector<8x64xf32>, vector<64x32xf32>, vector<8x32xf32> -> vector<8x32xf32>
      %c0_18 = arith.constant 0 : index
      %c0_19 = arith.constant 0 : index
      %19 = vector.load %arg6[%c0_18, %c0_19] : memref<1x32xf32, #tpu.memory_space<vmem>>, vector<1x32xf32>
      %20 = vector.broadcast %19 : vector<1x32xf32> to vector<8x32xf32>
      %21 = arith.addf %18, %20 : vector<8x32xf32>
      %c0_20 = arith.constant 0 : index
      %c0_21 = arith.constant 0 : index
      %22 = vector.load %arg16[%c0_20, %c0_21] : memref<8x32xf32, #tpu.memory_space<vmem>>, vector<8x32xf32>
      tpu.vector_store %arg16[%c0_20, %c0_21], %21 {strides = array<i32>} : memref<8x32xf32, #tpu.memory_space<vmem>>, vector<8x32xf32>,
      %c0_22 = arith.constant 0 : index
      %c0_23 = arith.constant 0 : index
      %23 = vector.load %arg7[%c0_22, %c0_23] : memref<32x16xf32, #tpu.memory_space<vmem>>, vector<32x16xf32>
      %cst_24 = arith.constant dense<0.000000e+00> : vector<8x16xf32>
      %24 = tpu.matmul %21, %23, %cst_24 {dimension_numbers = #tpu.dot_dimension_numbers<[1], [0], [0], [1], [0, 0, 1, 1], [], []>} : vector<8x32xf32>, vector<32x16xf32>, vector<8x16xf32> -> vector<8x16xf32>
      %c0_25 = arith.constant 0 : index
      %c0_26 = arith.constant 0 : index
      %25 = vector.load %arg8[%c0_25, %c0_26] : memref<1x16xf32, #tpu.memory_space<vmem>>, vector<1x16xf32>
      %26 = vector.broadcast %25 : vector<1x16xf32> to vector<8x16xf32>
      %27 = arith.addf %24, %26 : vector<8x16xf32>
      %c0_27 = arith.constant 0 : index
      %c0_28 = arith.constant 0 : index
      %28 = vector.load %arg17[%c0_27, %c0_28] : memref<8x16xf32, #tpu.memory_space<vmem>>, vector<8x16xf32>
      tpu.vector_store %arg17[%c0_27, %c0_28], %27 {strides = array<i32>} : memref<8x16xf32, #tpu.memory_space<vmem>>, vector<8x16xf32>,
      %29 = arith.mulf %21, %21 : vector<8x32xf32>
      %cst_29 = arith.constant dense<0.000000e+00> : vector<8xf32>
      %30 = vector.multi_reduction <add>, %29, %cst_29 [1] : vector<8x32xf32> to vector<8xf32>
      %31 = vector.shape_cast %30 : vector<8xf32> to vector<8x1xf32>
      %cst_30 = arith.constant 1.000000e-24 : f32
      %32 = vector.broadcast %cst_30 : f32 to vector<8x1xf32>
      %33 = arith.maximumf %31, %32 : vector<8x1xf32>
      %34 = math.rsqrt %33 : vector<8x1xf32>
      %35 = vector.broadcast %34 : vector<8x1xf32> to vector<8x32xf32>
      %36 = arith.mulf %21, %35 : vector<8x32xf32>
      %37 = arith.truncf %36 : vector<8x32xf32> to vector<8x32xbf16>
      %c0_31 = arith.constant 0 : index
      %c0_32 = arith.constant 0 : index
      %38 = vector.load %arg27[%c0_31, %c0_32] : memref<8x32xbf16, #tpu.memory_space<vmem>>, vector<8x32xbf16>
      tpu.vector_store %arg27[%c0_31, %c0_32], %37 {strides = array<i32>} : memref<8x32xbf16, #tpu.memory_space<vmem>>, vector<8x32xbf16>,
      %c0_33 = arith.constant 0 : index
      %c0_34 = arith.constant 0 : index
      %39 = vector.load %arg9[%c0_33, %c0_34] : memref<32x64xf32, #tpu.memory_space<vmem>>, vector<32x64xf32>
      %cst_35 = arith.constant 9.990000e-01 : f32
      %40 = vector.broadcast %cst_35 : f32 to vector<32x64xf32>
      %41 = arith.mulf %39, %40 : vector<32x64xf32>
      %c0_36 = arith.constant 0 : index
      %c0_37 = arith.constant 0 : index
      %42 = vector.load %arg3[%c0_36, %c0_37] : memref<32x64xf32, #tpu.memory_space<vmem>>, vector<32x64xf32>
      %cst_38 = arith.constant 1.000000e-03 : f32
      %43 = vector.broadcast %cst_38 : f32 to vector<32x64xf32>
      %44 = arith.mulf %42, %43 : vector<32x64xf32>
      %45 = arith.addf %41, %44 : vector<32x64xf32>
      %c0_39 = arith.constant 0 : index
      %c0_40 = arith.constant 0 : index
      %46 = vector.load %arg10[%c0_39, %c0_40] : memref<1x64xf32, #tpu.memory_space<vmem>>, vector<1x64xf32>
      %cst_41 = arith.constant 9.990000e-01 : f32
      %47 = vector.broadcast %cst_41 : f32 to vector<1x64xf32>
      %48 = arith.mulf %46, %47 : vector<1x64xf32>
      %c0_42 = arith.constant 0 : index
      %c0_43 = arith.constant 0 : index
      %49 = vector.load %arg4[%c0_42, %c0_43] : memref<1x64xf32, #tpu.memory_space<vmem>>, vector<1x64xf32>
      %cst_44 = arith.constant 1.000000e-03 : f32
      %50 = vector.broadcast %cst_44 : f32 to vector<1x64xf32>
      %51 = arith.mulf %49, %50 : vector<1x64xf32>
      %52 = arith.addf %48, %51 : vector<1x64xf32>
      %c0_45 = arith.constant 0 : index
      %c0_46 = arith.constant 0 : index
      %53 = vector.load %arg11[%c0_45, %c0_46] : memref<64x32xf32, #tpu.memory_space<vmem>>, vector<64x32xf32>
      %cst_47 = arith.constant 9.990000e-01 : f32
      %54 = vector.broadcast %cst_47 : f32 to vector<64x32xf32>
      %55 = arith.mulf %53, %54 : vector<64x32xf32>
      %c0_48 = arith.constant 0 : index
      %c0_49 = arith.constant 0 : index
      %56 = vector.load %arg5[%c0_48, %c0_49] : memref<64x32xf32, #tpu.memory_space<vmem>>, vector<64x32xf32>
      %cst_50 = arith.constant 1.000000e-03 : f32
      %57 = vector.broadcast %cst_50 : f32 to vector<64x32xf32>
      %58 = arith.mulf %56, %57 : vector<64x32xf32>
      %59 = arith.addf %55, %58 : vector<64x32xf32>
      %c0_51 = arith.constant 0 : index
      %c0_52 = arith.constant 0 : index
      %60 = vector.load %arg12[%c0_51, %c0_52] : memref<1x32xf32, #tpu.memory_space<vmem>>, vector<1x32xf32>
      %cst_53 = arith.constant 9.990000e-01 : f32
      %61 = vector.broadcast %cst_53 : f32 to vector<1x32xf32>
      %62 = arith.mulf %60, %61 : vector<1x32xf32>
      %c0_54 = arith.constant 0 : index
      %c0_55 = arith.constant 0 : index
      %63 = vector.load %arg6[%c0_54, %c0_55] : memref<1x32xf32, #tpu.memory_space<vmem>>, vector<1x32xf32>
      %cst_56 = arith.constant 1.000000e-03 : f32
      %64 = vector.broadcast %cst_56 : f32 to vector<1x32xf32>
      %65 = arith.mulf %63, %64 : vector<1x32xf32>
      %66 = arith.addf %62, %65 : vector<1x32xf32>
      %c0_57 = arith.constant 0 : index
      %c0_58 = arith.constant 0 : index
      %67 = vector.load %arg13[%c0_57, %c0_58] : memref<32x16xf32, #tpu.memory_space<vmem>>, vector<32x16xf32>
      %cst_59 = arith.constant 9.990000e-01 : f32
      %68 = vector.broadcast %cst_59 : f32 to vector<32x16xf32>
      %69 = arith.mulf %67, %68 : vector<32x16xf32>
      %c0_60 = arith.constant 0 : index
      %c0_61 = arith.constant 0 : index
      %70 = vector.load %arg7[%c0_60, %c0_61] : memref<32x16xf32, #tpu.memory_space<vmem>>, vector<32x16xf32>
      %cst_62 = arith.constant 1.000000e-03 : f32
      %71 = vector.broadcast %cst_62 : f32 to vector<32x16xf32>
      %72 = arith.mulf %70, %71 : vector<32x16xf32>
      %73 = arith.addf %69, %72 : vector<32x16xf32>
      %c0_63 = arith.constant 0 : index
      %c0_64 = arith.constant 0 : index
      %74 = vector.load %arg14[%c0_63, %c0_64] : memref<1x16xf32, #tpu.memory_space<vmem>>, vector<1x16xf32>
      %cst_65 = arith.constant 9.990000e-01 : f32
      %75 = vector.broadcast %cst_65 : f32 to vector<1x16xf32>
      %76 = arith.mulf %74, %75 : vector<1x16xf32>
      %c0_66 = arith.constant 0 : index
      %c0_67 = arith.constant 0 : index
      %77 = vector.load %arg8[%c0_66, %c0_67] : memref<1x16xf32, #tpu.memory_space<vmem>>, vector<1x16xf32>
      %cst_68 = arith.constant 1.000000e-03 : f32
      %78 = vector.broadcast %cst_68 : f32 to vector<1x16xf32>
      %79 = arith.mulf %77, %78 : vector<1x16xf32>
      %80 = arith.addf %76, %79 : vector<1x16xf32>
      %c0_69 = arith.constant 0 : index
      %c0_70 = arith.constant 0 : index
      %81 = vector.load %arg21[%c0_69, %c0_70] : memref<32x64xf32, #tpu.memory_space<vmem>>, vector<32x64xf32>
      tpu.vector_store %arg21[%c0_69, %c0_70], %45 {strides = array<i32>} : memref<32x64xf32, #tpu.memory_space<vmem>>, vector<32x64xf32>,
      %c0_71 = arith.constant 0 : index
      %c0_72 = arith.constant 0 : index
      %82 = vector.load %arg22[%c0_71, %c0_72] : memref<1x64xf32, #tpu.memory_space<vmem>>, vector<1x64xf32>
      tpu.vector_store %arg22[%c0_71, %c0_72], %52 {strides = array<i32>} : memref<1x64xf32, #tpu.memory_space<vmem>>, vector<1x64xf32>,
      %c0_73 = arith.constant 0 : index
      %c0_74 = arith.constant 0 : index
      %83 = vector.load %arg23[%c0_73, %c0_74] : memref<64x32xf32, #tpu.memory_space<vmem>>, vector<64x32xf32>
      tpu.vector_store %arg23[%c0_73, %c0_74], %59 {strides = array<i32>} : memref<64x32xf32, #tpu.memory_space<vmem>>, vector<64x32xf32>,
      %c0_75 = arith.constant 0 : index
      %c0_76 = arith.constant 0 : index
      %84 = vector.load %arg24[%c0_75, %c0_76] : memref<1x32xf32, #tpu.memory_space<vmem>>, vector<1x32xf32>
      tpu.vector_store %arg24[%c0_75, %c0_76], %66 {strides = array<i32>} : memref<1x32xf32, #tpu.memory_space<vmem>>, vector<1x32xf32>,
      %c0_77 = arith.constant 0 : index
      %c0_78 = arith.constant 0 : index
      %85 = vector.load %arg25[%c0_77, %c0_78] : memref<32x16xf32, #tpu.memory_space<vmem>>, vector<32x16xf32>
      tpu.vector_store %arg25[%c0_77, %c0_78], %73 {strides = array<i32>} : memref<32x16xf32, #tpu.memory_space<vmem>>, vector<32x16xf32>,
      %c0_79 = arith.constant 0 : index
      %c0_80 = arith.constant 0 : index
      %86 = vector.load %arg26[%c0_79, %c0_80] : memref<1x16xf32, #tpu.memory_space<vmem>>, vector<1x16xf32>
      tpu.vector_store %arg26[%c0_79, %c0_80], %80 {strides = array<i32>} : memref<1x16xf32, #tpu.memory_space<vmem>>, vector<1x16xf32>,
      %c0_81 = arith.constant 0 : index
      %c0_82 = arith.constant 0 : index
      %87 = vector.load %arg2[%c0_81, %c0_82] : memref<8x32xf32, #tpu.memory_space<vmem>>, vector<8x32xf32>
      %cst_83 = arith.constant dense<0.000000e+00> : vector<8x64xf32>
      %88 = tpu.matmul %87, %45, %cst_83 {dimension_numbers = #tpu.dot_dimension_numbers<[1], [0], [0], [1], [0, 0, 1, 1], [], []>} : vector<8x32xf32>, vector<32x64xf32>, vector<8x64xf32> -> vector<8x64xf32>
      %89 = vector.broadcast %52 : vector<1x64xf32> to vector<8x64xf32>
      %90 = arith.addf %88, %89 : vector<8x64xf32>
      %cst_84 = arith.constant 0.000000e+00 : f32
      %91 = vector.broadcast %cst_84 : f32 to vector<8x64xf32>
      %92 = arith.maximumf %90, %91 : vector<8x64xf32>
      %cst_85 = arith.constant dense<0.000000e+00> : vector<8x32xf32>
      %93 = tpu.matmul %92, %59, %cst_85 {dimension_numbers = #tpu.dot_dimension_numbers<[1], [0], [0], [1], [0, 0, 1, 1], [], []>} : vector<8x64xf32>, vector<64x32xf32>, vector<8x32xf32> -> vector<8x32xf32>
      %94 = vector.broadcast %66 : vector<1x32xf32> to vector<8x32xf32>
      %95 = arith.addf %93, %94 : vector<8x32xf32>
      %96 = arith.mulf %95, %95 : vector<8x32xf32>
      %cst_86 = arith.constant dense<0.000000e+00> : vector<8xf32>
      %97 = vector.multi_reduction <add>, %96, %cst_86 [1] : vector<8x32xf32> to vector<8xf32>
      %98 = vector.shape_cast %97 : vector<8xf32> to vector<8x1xf32>
      %cst_87 = arith.constant 1.000000e-24 : f32
      %99 = vector.broadcast %cst_87 : f32 to vector<8x1xf32>
      %100 = arith.maximumf %98, %99 : vector<8x1xf32>
      %101 = math.rsqrt %100 : vector<8x1xf32>
      %102 = vector.broadcast %101 : vector<8x1xf32> to vector<8x32xf32>
      %103 = arith.mulf %95, %102 : vector<8x32xf32>
      %c0_88 = arith.constant 0 : index
      %c0_89 = arith.constant 0 : index
      %104 = vector.load %arg18[%c0_88, %c0_89] : memref<8x32xf32, #tpu.memory_space<vmem>>, vector<8x32xf32>
      tpu.vector_store %arg18[%c0_88, %c0_89], %103 {strides = array<i32>} : memref<8x32xf32, #tpu.memory_space<vmem>>, vector<8x32xf32>,
      %105 = arith.mulf %36, %103 : vector<8x32xf32>
      %cst_90 = arith.constant dense<0.000000e+00> : vector<8xf32>
      %106 = vector.multi_reduction <add>, %105, %cst_90 [1] : vector<8x32xf32> to vector<8xf32>
      %107 = vector.shape_cast %106 : vector<8xf32> to vector<8x1xf32>
      %cst_91 = arith.constant 14.2857141 : f32
      %108 = vector.broadcast %cst_91 : f32 to vector<8x1xf32>
      %109 = arith.mulf %107, %108 : vector<8x1xf32>
      %c0_92 = arith.constant 0 : index
      %c0_93 = arith.constant 0 : index
      %110 = vector.load %arg19[%c0_92, %c0_93] : memref<8x1xf32, #tpu.memory_space<vmem>>, vector<8x1xf32>
      tpu.vector_store %arg19[%c0_92, %c0_93], %109 {strides = array<i32>} : memref<8x1xf32, #tpu.memory_space<vmem>>, vector<8x1xf32>,
    } else {
    }
    %c0 = arith.constant 0 : index
    %c0_1 = arith.constant 0 : index
    %3 = vector.load %arg27[%c0, %c0_1] : memref<8x32xbf16, #tpu.memory_space<vmem>>, vector<8x32xbf16>
    %c0_2 = arith.constant 0 : index
    %c0_3 = arith.constant 0 : index
    %4 = vector.load %arg15[%c0_2, %c0_3] : memref<32x256xbf16, #tpu.memory_space<vmem>>, vector<32x256xbf16>
    %cst = arith.constant dense<0.000000e+00> : vector<8x256xf32>
    %5 = tpu.matmul %3, %4, %cst {dimension_numbers = #tpu.dot_dimension_numbers<[1], [0], [0], [1], [0, 0, 1, 1], [], []>} : vector<8x32xbf16>, vector<32x256xbf16>, vector<8x256xf32> -> vector<8x256xf32>
    %cst_4 = arith.constant 14.2857141 : f32
    %6 = vector.broadcast %cst_4 : f32 to vector<8x256xf32>
    %7 = arith.mulf %5, %6 : vector<8x256xf32>
    %c0_5 = arith.constant 0 : index
    %c0_6 = arith.constant 0 : index
    %8 = vector.load %arg20[%c0_5, %c0_6] : memref<8x256xf32, #tpu.memory_space<vmem>>, vector<8x256xf32>
    tpu.vector_store %arg20[%c0_5, %c0_6], %7 {strides = array<i32>} : memref<8x256xf32, #tpu.memory_space<vmem>>, vector<8x256xf32>,
    return
  }
  func.func @transform_0(%arg0: i32) -> (i32, i32) {
    %c0_i32 = arith.constant 0 : i32
    %c0_i32_0 = arith.constant 0 : i32
    %c0_i32_1 = arith.constant 0 : i32
    return %c0_i32, %c0_i32_0 : i32, i32
  }
  func.func @transform_1(%arg0: i32) -> (i32, i32) {
    %c0_i32 = arith.constant 0 : i32
    %c0_i32_0 = arith.constant 0 : i32
    %c0_i32_1 = arith.constant 0 : i32
    return %c0_i32, %c0_i32_0 : i32, i32
  }
  func.func @transform_2(%arg0: i32) -> (i32, i32) {
    %c0_i32 = arith.constant 0 : i32
    %c0_i32_0 = arith.constant 0 : i32
    %c0_i32_1 = arith.constant 0 : i32
    return %c0_i32, %c0_i32_0 : i32, i32
  }
  func.func @transform_3(%arg0: i32) -> (i32, i32) {
    %c0_i32 = arith.constant 0 : i32
    %c0_i32_0 = arith.constant 0 : i32
    %c0_i32_1 = arith.constant 0 : i32
    return %c0_i32, %c0_i32_0 : i32, i32
  }
  func.func @transform_4(%arg0: i32) -> (i32, i32) {
    %c0_i32 = arith.constant 0 : i32
    %c0_i32_0 = arith.constant 0 : i32
    %c0_i32_1 = arith.constant 0 : i32
    return %c0_i32, %c0_i32_0 : i32, i32
  }
  func.func @transform_5(%arg0: i32) -> (i32, i32) {
    %c0_i32 = arith.constant 0 : i32
    %c0_i32_0 = arith.constant 0 : i32
    %c0_i32_1 = arith.constant 0 : i32
    return %c0_i32, %c0_i32_0 : i32, i32
  }
  func.func @transform_6(%arg0: i32) -> (i32, i32) {
    %c0_i32 = arith.constant 0 : i32
    %c0_i32_0 = arith.constant 0 : i32
    %c0_i32_1 = arith.constant 0 : i32
    return %c0_i32, %c0_i32_0 : i32, i32
  }
  func.func @transform_7(%arg0: i32) -> (i32, i32) {
    %c0_i32 = arith.constant 0 : i32
    %c0_i32_0 = arith.constant 0 : i32
    %c0_i32_1 = arith.constant 0 : i32
    return %c0_i32, %c0_i32_0 : i32, i32
  }
  func.func @transform_8(%arg0: i32) -> (i32, i32) {
    %c0_i32 = arith.constant 0 : i32
    %c0_i32_0 = arith.constant 0 : i32
    %c0_i32_1 = arith.constant 0 : i32
    return %c0_i32, %c0_i32_0 : i32, i32
  }
  func.func @transform_9(%arg0: i32) -> (i32, i32) {
    %c0_i32 = arith.constant 0 : i32
    %c0_i32_0 = arith.constant 0 : i32
    %c0_i32_1 = arith.constant 0 : i32
    return %c0_i32, %c0_i32_0 : i32, i32
  }
  func.func @transform_10(%arg0: i32) -> (i32, i32) {
    %c0_i32 = arith.constant 0 : i32
    %c0_i32_0 = arith.constant 0 : i32
    %c0_i32_1 = arith.constant 0 : i32
    return %c0_i32, %c0_i32_0 : i32, i32
  }
  func.func @transform_11(%arg0: i32) -> (i32, i32) {
    %c0_i32 = arith.constant 0 : i32
    %c0_i32_0 = arith.constant 0 : i32
    %c0_i32_1 = arith.constant 0 : i32
    return %c0_i32, %c0_i32_0 : i32, i32
  }
  func.func @transform_12(%arg0: i32) -> (i32, i32) {
    %c0_i32 = arith.constant 0 : i32
    %c0_i32_0 = arith.constant 0 : i32
    %c0_i32_1 = arith.constant 0 : i32
    return %c0_i32, %c0_i32_0 : i32, i32
  }
  func.func @transform_13(%arg0: i32) -> (i32, i32) {
    %c0_i32 = arith.constant 0 : i32
    %c0_i32_0 = arith.constant 0 : i32
    %c0_i32_1 = arith.constant 0 : i32
    return %c0_i32, %c0_i32_0 : i32, i32
  }
  func.func @transform_14(%arg0: i32) -> (i32, i32) {
    %c0_i32 = arith.constant 0 : i32
    %c0_i32_0 = arith.constant 0 : i32
    return %c0_i32, %arg0 : i32, i32
  }
  func.func @transform_15(%arg0: i32) -> (i32, i32) {
    %c0_i32 = arith.constant 0 : i32
    %c0_i32_0 = arith.constant 0 : i32
    %c0_i32_1 = arith.constant 0 : i32
    return %c0_i32, %c0_i32_0 : i32, i32
  }
  func.func @transform_16(%arg0: i32) -> (i32, i32) {
    %c0_i32 = arith.constant 0 : i32
    %c0_i32_0 = arith.constant 0 : i32
    %c0_i32_1 = arith.constant 0 : i32
    return %c0_i32, %c0_i32_0 : i32, i32
  }
  func.func @transform_17(%arg0: i32) -> (i32, i32) {
    %c0_i32 = arith.constant 0 : i32
    %c0_i32_0 = arith.constant 0 : i32
    %c0_i32_1 = arith.constant 0 : i32
    return %c0_i32, %c0_i32_0 : i32, i32
  }
  func.func @transform_18(%arg0: i32) -> (i32, i32) {
    %c0_i32 = arith.constant 0 : i32
    %c0_i32_0 = arith.constant 0 : i32
    %c0_i32_1 = arith.constant 0 : i32
    return %c0_i32, %c0_i32_0 : i32, i32
  }
  func.func @transform_19(%arg0: i32) -> (i32, i32) {
    %c0_i32 = arith.constant 0 : i32
    %c0_i32_0 = arith.constant 0 : i32
    return %c0_i32, %arg0 : i32, i32
  }
  func.func @transform_20(%arg0: i32) -> (i32, i32) {
    %c0_i32 = arith.constant 0 : i32
    %c0_i32_0 = arith.constant 0 : i32
    %c0_i32_1 = arith.constant 0 : i32
    return %c0_i32, %c0_i32_0 : i32, i32
  }
  func.func @transform_21(%arg0: i32) -> (i32, i32) {
    %c0_i32 = arith.constant 0 : i32
    %c0_i32_0 = arith.constant 0 : i32
    %c0_i32_1 = arith.constant 0 : i32
    return %c0_i32, %c0_i32_0 : i32, i32
  }
  func.func @transform_22(%arg0: i32) -> (i32, i32) {
    %c0_i32 = arith.constant 0 : i32
    %c0_i32_0 = arith.constant 0 : i32
    %c0_i32_1 = arith.constant 0 : i32
    return %c0_i32, %c0_i32_0 : i32, i32
  }
  func.func @transform_23(%arg0: i32) -> (i32, i32) {
    %c0_i32 = arith.constant 0 : i32
    %c0_i32_0 = arith.constant 0 : i32
    %c0_i32_1 = arith.constant 0 : i32
    return %c0_i32, %c0_i32_0 : i32, i32
  }
  func.func @transform_24(%arg0: i32) -> (i32, i32) {
    %c0_i32 = arith.constant 0 : i32
    %c0_i32_0 = arith.constant 0 : i32
    %c0_i32_1 = arith.constant 0 : i32
    return %c0_i32, %c0_i32_0 : i32, i32
  }
  func.func @transform_25(%arg0: i32) -> (i32, i32) {
    %c0_i32 = arith.constant 0 : i32
    %c0_i32_0 = arith.constant 0 : i32
    %c0_i32_1 = arith.constant 0 : i32
    return %c0_i32, %c0_i32_0 : i32, i32
  }
}

</mosaic_0001>

<bundles_post_ra>
// kernel: adamoco_forward.1
= control target key start
LH: loop header
LB: loop body
LE: loop exit
PB: predicated region body
PF: predicated region fallthrough
CT: control target
= control target key end

     0   :  { %s2083_s0 = inlined_call_operand.vmem [shape: f32[8,32], index: 0, kind: input, shape index: {}]   ;;  %s2084_s1 = inlined_call_operand.vmem [shape: f32[8,32], index: 1, kind: input, shape index: {}]   ;;  %s2085_s2 = inlined_call_operand.vmem [shape: f32[32,64], index: 2, kind: input, shape index: {}]   ;;  %s2086_s3 = inlined_call_operand.vmem [shape: f32[1,64], index: 3, kind: input, shape index: {}]   ;;  %s2087_s4 = inlined_call_operand.vmem [shape: f32[64,32], index: 4, kind: input, shape index: {}]   ;;  %s2088_s5 = inlined_call_operand.vmem [shape: f32[1,32], index: 5, kind: input, shape index: {}]   ;;  %s2089_s6 = inlined_call_operand.vmem [shape: f32[32,16], index: 6, kind: input, shape index: {}]   ;;  %s2090_s7 = inlined_call_operand.vmem [shape: f32[1,16], index: 7, kind: input, shape index: {}]   ;;  %s2091_s8 = inlined_call_operand.vmem [shape: f32[32,64], index: 8, kind: input, shape index: {}, may-alias: {8,20}]   ;;  %s2092_s9 = inlined_call_operand.vmem [shape: f32[1,64], index: 9, kind: input, shape index: {}, may-alias: {9,21}]   ;;  %s2093_s10 = inlined_call_operand.vmem [shape: f32[64,32], index: 10, kind: input, shape index: {}, may-alias: {10,22}]   ;;  %s2094_s11 = inlined_call_operand.vmem [shape: f32[1,32], index: 11, kind: input, shape index: {}, may-alias: {11,23}]   ;;  %s2095_s12 = inlined_call_operand.vmem [shape: f32[32,16], index: 12, kind: input, shape index: {}, may-alias: {12,24}]   ;;  %s2096_s13 = inlined_call_operand.vmem [shape: f32[1,16], index: 13, kind: input, shape index: {}, may-alias: {13,25}]   ;;  %s2097_s14 = inlined_call_operand.hbm [shape: bf16[32,1000], index: 14, kind: input, shape index: {}]   ;;  %s2098_s15 = inlined_call_operand.hbm [shape: f32[8,32], index: 15, kind: output, shape index: {0}]   ;;  %s2099_s16 = inlined_call_operand.hbm [shape: f32[8,16], index: 16, kind: output, shape index: {1}]   ;;  %s2100_s17 = inlined_call_operand.hbm [shape: f32[8,32], index: 17, kind: output, shape index: {2}]   ;;  %s2101_s18 = inlined_call_operand.vmem [shape: f32[8,1], index: 18, kind: output, shape index: {3}]   ;;  %s2102_s19 = inlined_call_operand.vmem [shape: f32[8,1000], index: 19, kind: output, shape index: {4}]   ;;  %s2103_s20 = inlined_call_operand.vmem [shape: f32[32,64], index: 20, kind: output, shape index: {5}, may-alias: {8,20}]   ;;  %s2104_s21 = inlined_call_operand.vmem [shape: f32[1,64], index: 21, kind: output, shape index: {6}, may-alias: {9,21}]   ;;  %s2105_s22 = inlined_call_operand.vmem [shape: f32[64,32], index: 22, kind: output, shape index: {7}, may-alias: {10,22}]   ;;  %s2106_s23 = inlined_call_operand.vmem [shape: f32[1,32], index: 23, kind: output, shape index: {8}, may-alias: {11,23}]   ;;  %s2107_s24 = inlined_call_operand.vmem [shape: f32[32,16], index: 24, kind: output, shape index: {9}, may-alias: {12,24}]   ;;  %s2108_s25 = inlined_call_operand.vmem [shape: f32[1,16], index: 25, kind: output, shape index: {10}, may-alias: {13,25}]  }
   0x1   :  { %2123 = sst [smem:[#allocation16_spill]] %s2083_s0 }
   0x2   :  { %2124 = sst [smem:[#allocation17_spill]] %s2084_s1 }
   0x3   :  { %2125 = sst [smem:[#allocation18_spill]] %s2085_s2 }
   0x4   :  { %2126 = sst [smem:[#allocation19_spill]] %s2086_s3 }
   0x5   :  { %2127 = sst [smem:[#allocation20_spill]] %s2087_s4 }
   0x6   :  { %2128 = sst [smem:[#allocation21_spill]] %s2088_s5 }
   0x7   :  { %2129 = sst [smem:[#allocation22_spill]] %s2089_s6 }
   0x8   :  { %2130 = sst [smem:[#allocation23_spill]] %s2090_s7 }
   0x9   :  { %2131 = sst [smem:[#allocation24_spill]] %s2091_s8 }
   0xa   :  { %2132 = sst [smem:[#allocation25_spill]] %s2092_s9 }
   0xb   :  { %2133 = sst [smem:[#allocation26_spill]] %s2093_s10 }
   0xc   :  { %2134 = sst [smem:[#allocation27_spill]] %s2094_s11 }
   0xd   :  { %2135 = sst [smem:[#allocation28_spill]] %s2098_s15 }
   0xe   :  { %2136 = sst [smem:[#allocation29_spill]] %s2099_s16 }
   0xf   :  { %2137 = sst [smem:[#allocation30_spill]] %s2100_s17 }
  0x10   :  { %31 = vsyncpa [#allocation4], 0 }
  0x11   :  { %33 = vsyncpa [#allocation4 + $0x1], 0 }
  0x12   :  { %34 = vsyncpa [#allocation5], 0 }
  0x13   :  { %35 = vsyncpa [#allocation8], 0  ;;  %s1738_s29 = smov 0   ;;  %s1740_s2 = smov 0  }
  0x14   :  { %s1742_s6 = smov 0   ;;  %s1744_s30 = smov 0  }
  0x15 LB: > { %2138 = sst [smem:[#allocation13_spill]] %s1596_s6  ;;  %s1757_s7 = sadd.s32 4294967295, %s1600_s30   ;;  %s1600_s30 = sphi %s1744_s30, %s2160_s30   ;;  %s1596_s6 = sphi %s1742_s6, %s2162_s6   ;;  %s1592_s2 = sphi %s1740_s2, %s2164_s2   ;;  %s1588_s29 = sphi %s1738_s29, %s2163_s29  }
  0x16   : > { %s1760_s3 = sadd.s32 1, %s1600_s30   ;;  %s342_s1 = sadd.s32 1, %s1596_s6 }
  0x17   : > { %2139 = sst [smem:[#allocation14_spill]] %s1760_s3  ;;  %s339_s26 = ssub.s32 %s1600_s30, %s1760_s3 }
  0x18   : > { %p340_p0 = scmp.eq.s32.totalorder %s339_s26, 0  ;;  %p349_p1 = scmp.ne.s32.totalorder %s1596_s6, %s1592_s2 }
  0x19   : > { %p350_p2 = scmp.eq.s32.totalorder %s1600_s30, 0  ;;  %p355_p3 = scmp.ne.s32.totalorder %s1592_s2, %s1588_s29 }
  0x1a   : > { %s1770_s8 = scalar_select %p340_p0, %s1596_s6, %s342_s1  }
  0x1b   : > { %p1772_p4 = por %p350_p2, %p349_p1  ;;  %p356_p5 = scmp.eq.s32.totalorder %s1757_s7, 0 }
  0x1c   : > { %2140 = sst [smem:[#allocation15_spill]] %s1770_s8  ;;  %p1392_p6 = scmp.lt.s32.totalorder %s1600_s30, 4 }
  0x1d   : > { %p1778_p7 = por %p356_p5, %p355_p3  ;;  %s657_s28 = sand.u32 1, %s1596_s6  }
  0x1e   : > { %s1330_s9 = sshll.u32 %s657_s28, 5  ;;  %s1369_s5 = sshll.u32 %s1600_s30, 3 }
  0x1f   : > { %s666_s29 = scalar_lea.hbm %s2097_s14, %s1369_s5  ;;  %s661_s1 = scalar_lea.vmem [#allocation3], %s1330_s9 }
  0x20   : > { %s669_s8 = sshll.u32 %s661_s1, 4  ;;  %s667_s3 = sshll.u32 %s666_s29, 4  ;;  %s670_s8 = int_to_ptr.vmem [resolvable:$true] %s669_s8  ;;  %s668_s3 = int_to_ptr.hbm [resolvable:$true] %s667_s3 }
  0x21   : > { %p1789_p8 = pnand %p1392_p6, %p1772_p4  ;;  %s658_s15 = scalar_lea.sflag [#allocation4], %s657_s28 }
  0x22   : > { %s1444_s16 = sshra.s32 %s668_s3, 4  ;;  %s1451_s0 = scalar_lea.hbm %s2097_s14, 128  ;;  %s1445_s16 = int_to_ptr.hbm [resolvable:$true] %s1444_s16 }
  0x23   : > { %s1446_s6 = scalar_lea.hbm %s1445_s16, 32  ;;  %p1448_p10 = pneg %p1789_p8 }
  0x24   : > { %p1447_p9 = scmp.ne.s32.totalorder %s1445_s16, %s1446_s6  ;;  %p1452_p13 = scmp.lt.s32.totalorder %s1445_s16, %s2097_s14 }
  0x25   : > { %p1453_p0 = scmp.lt.s32.totalorder %s1451_s0, %s1446_s6 }
  0x26   : > { %p1449_p11 = pnand %p1448_p10, %p1447_p9 }
  0x27   : > { %p1454_p1 = por %p1453_p0, %p1452_p13 }
  0x28   : > { %p1450_p12 = pneg %p1449_p11 }
  0x2a   : > { %p1455_p2 = pnand %p1454_p1, %p1450_p12 }
  0x2c   : > { %1458 = shalt.err (!%p1455_p2)
}
  0x2d   : > { %s1602_s28 = smov 512   ;;  %s1603_s29 = smov 128  }
  0x2e   : > { %s1604_s1 = smov 8   ;;  %p1333_p3 = scmp.ge.s32.totalorder %s1600_s30, 1 }
  0x2f   : > { %1391 = dma.hbm_to_vmem [thread:$0]  (!%p1789_p8), %s668_s3, 512, %s670_s8, %s658_s15, %s1602_s28, %s1603_s29, %s1604_s1  }
  0x30   : > { %p677_p4 = scmp.lt.s32.totalorder %s1600_s30, 5 }
  0x32   : > { %p678_p5 = pnand %p1333_p3, %p677_p4 }
  0x33   : > { %s683_s9 = sand.u32 (!%p678_p5), 1, %s1592_s2  }
  0x34   : > { %681 = sbr.rel (%p678_p5) target bundleno = 757 (0x2f5), region = 80  ;;  %s1334_s16 = sshll.u32 (!%p678_p5), %s683_s9, 5 }
  0x35   : > { %s684_s6 = scalar_lea.sflag (!%p678_p5), [#allocation4], %s683_s9  ;;  %s1806_s5 = scalar_lea.vmem (!%p678_p5), [#allocation3], %s1334_s16 }
  0x39   : > { %1575 = dma.done.wait (%p1778_p7), %s684_s6, 512  }
  0x3a   : > { %1577 = vsyncadd (%p1778_p7), %s684_s6, 4294966784  ;;  %s1335_s0 = sshll.u32 %s1757_s7, 1  ;;  %p1337_p8 = scmp.ne.s32.totalorder %s1757_s7, 0 }
  0x3b   : > { %p757_p6 = scmp.lt.s32.totalorder %s1335_s0, 7  ;;  %s2144_s27 = sld [smem:[#allocation18_spill]] (!%p1337_p8) }
  0x3c   : > { %766 = sbr.rel (%p1337_p8) target bundleno = 608 (0x260), region = 88  ;;  %s2145_s6 = sld [smem:[#allocation24_spill]] (!%p1337_p8) }
  0x3d   : > { %s2166_s0 = smov (!%p757_p6, %s1335_s0), 7  ;;  %s2147_s4 = sld [smem:[#allocation23_spill]] (!%p1337_p8) }
  0x3e   : > { %s1336_s15 = sshll.u32 %s2166_s0, 3  ;;  %s2148_s17 = sld [smem:[#allocation16_spill]] (!%p1337_p8) }
  0x3f   : > { %s1816_s3 = scalar_lea.vmem %s2102_s19, %s1336_s15  ;;  %s2149_s9 = sld [smem:[#allocation20_spill]] (!%p1337_p8) }
  0x40   : > { %s2150_s10 = sld [smem:[#allocation26_spill]] (!%p1337_p8) }
  0x41   : > { %v771_v0 = vld [vmem:[%s2144_s27 + $0x18] sm:$0xff]  ;;  %v770_v1 = vld [vmem:[%s2144_s27 + $0x10] sm:$0xff]  ;;  %v769_v2 = vld [vmem:[%s2144_s27 + $0x8] sm:$0xff]  ;;  %vm776_vm0 = vcmask 261120   ;;  %vm813_vm1 = vcmask 523264   ;;  %vm1005_vm2 = vcmask 122880  }
  0x42   : > { %792 = vmatpush.msra.mxu2 %v771_v0  ;;  %s2146_s0 = smov %s2145_s6  ;;  %v893_v3 = vld [vmem:[%s2145_s6 + $0x18] sm:$0xff]  ;;  %v905_v4 = vmul.f32 0.001, %v771_v0  ;;  %v768_v5 = vld [vmem:[%s2144_s27] sm:$0xff]  ;;  %v904_v15 = vmul.f32 0.001, %v770_v1 }
  0x43   : > { %v897_v6 = vmul.f32 0.999, %v893_v3  ;;  %v980_v7 = vld [vmem:[%s2096_s13] sm:$0x1]  ;;  %v892_v11 = vld [vmem:[%s2146_s0 + $0x10] sm:$0xff]  ;;  %v891_v12 = vld [vmem:[%s2146_s0 + $0x8] sm:$0xff] }
  0x44   : > { %v982_v8 = vld [vmem:[%s2147_s4] sm:$0x1]  ;;  %793 = vmatpush.msra.mxu2 %v770_v1  ;;  %v981_v9 = vmul.f32 0.999, %v980_v7  ;;  %v896_v14 = vmul.f32 0.999, %v892_v11 }
  0x45   : > { %v983_v10 = vmul.f32 0.001, %v982_v8  ;;  %v909_v13 = vadd.f32 %v905_v4, %v897_v6  ;;  %v895_v16 = vmul.f32 0.999, %v891_v12  ;;  %v767_v17 = vld [vmem:[%s2148_s17] sm:$0xff]  ;;  %v808_v24 = vld [vmem:[%s2149_s9 + $0x38] sm:$0xff] }
  0x46   : > { %794 = vmatpush.msra.mxu2 %v769_v2  ;;  %v903_v19 = vmul.f32 0.001, %v769_v2  ;;  %v890_v20 = vld [vmem:[%s2146_s0] sm:$0xff]  ;;  %v902_v21 = vmul.f32 0.001, %v768_v5  ;;  %v908_v22 = vadd.f32 %v904_v15, %v896_v14  ;;  %v807_v25 = vld [vmem:[%s2149_s9 + $0x30] sm:$0xff]  ;;  %825 = vmatpush.msra.mxu1 %v808_v24 }
  0x47   : > { %v984_v18 = vadd.f32 %v983_v10, %v981_v9  ;;  %988 = vst.msk [vmem:[%s2103_s20 + $0x18] sm:$0xff] %vm813_vm1, %v909_v13  ;;  %1026 = vmatpush.msra.mxu3 %v909_v13  ;;  %v894_v23 = vmul.f32 0.999, %v890_v20  ;;  %v922_v27 = vld [vmem:[%s2150_s10 + $0x38] sm:$0xff]  ;;  %v806_v29 = vld [vmem:[%s2149_s9 + $0x28] sm:$0xff]  ;;  %s2151_s30 = sld [smem:[#allocation17_spill]] }
  0x48   : > { %795 = vmatpush.msra.mxu2 %v768_v5  ;;  %v907_v26 = vadd.f32 %v903_v19, %v895_v16  ;;  %987 = vst.msk [vmem:[%s2103_s20 + $0x10] sm:$0xff] %vm813_vm1, %v908_v22  ;;  %v930_v30 = vmul.f32 0.999, %v922_v27  ;;  %v946_v31 = vmul.f32 0.001, %v808_v24  ;;  %826 = vmatpush.msra.mxu1 %v807_v25  ;;  %v805_v33 = vld [vmem:[%s2149_s9 + $0x20] sm:$0xff] }
  0x49   : > { %1006 = vst.msk [vmem:[%s2108_s25] sm:$0x1] %vm1005_vm2, %v984_v18  ;;  %1338 = vmatmul.msk.f32.vlgmr.msra.gmra.mxu2 %vm776_vm0, %v767_v17  ;;  %1027 = vmatpush.msra.mxu3 %v908_v22  ;;  %v906_v28 = vadd.f32 %v902_v21, %v894_v23  ;;  %v804_v35 = vld [vmem:[%s2149_s9 + $0x18] sm:$0xff]  ;;  %v945_v38 = vmul.f32 0.001, %v807_v25  ;;  %v803_v43 = vld [vmem:[%s2149_s9 + $0x10] sm:$0xff] }
  0x4a   : > { %986 = vst.msk [vmem:[%s2103_s20 + $0x8] sm:$0xff] %vm813_vm1, %v907_v26  ;;  %v954_v34 = vadd.f32 %v946_v31, %v930_v30  ;;  %827 = vmatpush.msra.mxu1 %v806_v29  ;;  %v944_v42 = vmul.f32 0.001, %v806_v29  ;;  %v943_v47 = vmul.f32 0.001, %v805_v33  ;;  %v802_v48 = vld [vmem:[%s2149_s9 + $0x8] sm:$0xff] }
  0x4b   : > { %1028 = vmatpush.msra.mxu3 %v907_v26  ;;  %985 = vst.msk [vmem:[%s2103_s20] sm:$0xff] %vm813_vm1, %v906_v28  ;;  %v942_v52 = vmul.f32 0.001, %v804_v35  ;;  %v801_v53 = vld [vmem:[%s2149_s9] sm:$0xff]  ;;  %s2152_s17 = sld [smem:[#allocation25_spill]]  ;;  %vm989_vm3 = vcmask 516096  }
  0x4c   : > { %998 = vst.msk [vmem:[%s2105_s22 + $0x38] sm:$0xff] %vm776_vm0, %v954_v34  ;;  %1049 = vmatpush.msra.mxu0 %v954_v34  ;;  %828 = vmatpush.msra.mxu1 %v805_v33  ;;  %s2153_s26 = sld [smem:[#allocation19_spill]]  ;;  %v941_v61 = vmul.f32 0.001, %v803_v43  ;;  %v940_v1 = vmul.f32 0.001, %v802_v48 }
  0x4d   : > { %v1007_v32 = vld [vmem:[%s2151_s30] sm:$0xff]  ;;  %1029 = vmatpush.msra.mxu3 %v906_v28  ;;  %v939_v6 = vmul.f32 0.001, %v801_v53  ;;  %s2154_s28 = sld [smem:[#allocation22_spill]]  ;;  %vm999_vm4 = vcmask 253952   ;;  %vm869_vm5 = vcmask 130048  }
  0x4e   : > { %1341 = vmatmul.msk.f32.vlgmr.msra.gmra.mxu3 %vm776_vm0, %v1007_v32  ;;  %829 = vmatpush.msra.mxu1 %v804_v35  ;;  %s2155_s11 = sld [smem:[#allocation27_spill]]  ;;  %v960_v35 = vld [vmem:[%s2095_s12] sm:$0xff]  ;;  %vm888_vm9 = vcmask 257024   ;;  %vm1083_vm13 = vcmask 7168  }
  0x4f   : > { %s2156_s0 = sld [smem:[#allocation21_spill]] }
  0x50   : > { %830 = vmatpush.msra.mxu1 %v803_v43 }
  0x51   : > { %v910_v54 = vld [vmem:[%s2152_s17] sm:$0x1] }
  0x52   : > { %831 = vmatpush.msra.mxu1 %v802_v48  ;;  %v912_v55 = vld [vmem:[%s2153_s26] sm:$0x1]  ;;  %v911_v57 = vmul.f32 0.999, %v910_v54 }
  0x53   : > { %v921_v36 = vld [vmem:[%s2150_s10 + $0x30] sm:$0xff]  ;;  %v920_v39 = vld [vmem:[%s2150_s10 + $0x28] sm:$0xff]  ;;  %v919_v44 = vld [vmem:[%s2150_s10 + $0x20] sm:$0xff]  ;;  %v913_v58 = vmul.f32 0.001, %v912_v55 }
  0x54   : > { %v929_v37 = vmul.f32 0.999, %v921_v36  ;;  %v928_v41 = vmul.f32 0.999, %v920_v39  ;;  %v927_v46 = vmul.f32 0.999, %v919_v44  ;;  %832 = vmatpush.msra.mxu1 %v801_v53 }
  0x55   : > { %v914_v63 = vadd.f32 %v913_v58, %v911_v57  ;;  %v841_v7 = vld [vmem:[%s2154_s28 + $0x18] sm:$0xff]  ;;  %v840_v8 = vld [vmem:[%s2154_s28 + $0x10] sm:$0xff]  ;;  %v1437_v10 = vld [vmem:[%s2153_s26] ss:$0 sm:$0xff] }
  0x56   : > { %v953_v40 = vadd.f32 %v945_v38, %v929_v37  ;;  %v952_v45 = vadd.f32 %v944_v42, %v928_v41  ;;  %v951_v50 = vadd.f32 %v943_v47, %v927_v46  ;;  %861 = vmatpush.msrb.mxu2 %v841_v7  ;;  %v839_v18 = vld [vmem:[%s2154_s28 + $0x8] sm:$0xff]  ;;  %v838_v19 = vld [vmem:[%s2154_s28] sm:$0xff]  ;;  %v962_v37 = vld [vmem:[%s2095_s12 + $0x10] sm:$0xff]  ;;  %v975_v46 = vmul.f32 0.001, %v841_v7 }
  0x57   : > { %990 = vst.msk [vmem:[%s2104_s21] sm:$0x1] %vm989_vm3, %v914_v63  ;;  %v1009_v13 = vperm.slane %v914_v63, 0  ;;  %v955_v20 = vld [vmem:[%s2155_s11] sm:$0x1]  ;;  %v961_v36 = vld [vmem:[%s2095_s12 + $0x8] sm:$0xff] }
  0x58   : > { %997 = vst.msk [vmem:[%s2105_s22 + $0x30] sm:$0xff] %vm776_vm0, %v953_v40  ;;  %1050 = vmatpush.msra.mxu0 %v953_v40  ;;  %862 = vmatpush.msrb.mxu2 %v840_v8  ;;  %v957_v21 = vld [vmem:[%s2156_s0] sm:$0x1]  ;;  %v956_v22 = vmul.f32 0.999, %v955_v20  ;;  %v963_v39 = vld [vmem:[%s2095_s12 + $0x18] sm:$0xff] }
  0x59   : > { %v958_v23 = vmul.f32 0.001, %v957_v21  ;;  %v1438_v25 = vld [vmem:[%s2156_s0] ss:$0 sm:$0xff]  ;;  %v972_v38 = vmul.f32 0.001, %v838_v19 }
  0x5a   : > { %1051 = vmatpush.msra.mxu0 %v952_v45  ;;  %863 = vmatpush.msrb.mxu2 %v839_v18  ;;  %v964_v40 = vmul.f32 0.999, %v960_v35  ;;  %v965_v41 = vmul.f32 0.999, %v961_v36  ;;  %v966_v42 = vmul.f32 0.999, %v962_v37 }
  0x5b   : > { %v959_v24 = vadd.f32 %v958_v23, %v956_v22  ;;  %v967_v43 = vmul.f32 0.999, %v963_v39  ;;  %v973_v44 = vmul.f32 0.001, %v839_v18  ;;  %v1439_v57 = vld [vmem:[%s2147_s4] ss:$0 sm:$0xff] }
  0x5c   : > { %1052 = vmatpush.msra.mxu0 %v951_v50  ;;  %864 = vmatpush.msrb.mxu2 %v838_v19  ;;  %v976_v47 = vadd.f32 %v972_v38, %v964_v40 }
  0x5d   : > { %1000 = vst.msk [vmem:[%s2106_s23] sm:$0x1] %vm999_vm4, %v959_v24  ;;  %v1036_v28 = vperm.slane %v959_v24, 0  ;;  %v977_v48 = vadd.f32 %v973_v44, %v965_v41 }
  0x5e   : > { %1001 = vst.msk [vmem:[%s2107_s24] sm:$0xff] %vm869_vm5, %v976_v47 }
  0x5f   : > { %v918_v49 = vld [vmem:[%s2150_s10 + $0x18] sm:$0xff]  ;;  %1002 = vst.msk [vmem:[%s2107_s24 + $0x8] sm:$0xff] %vm869_vm5, %v977_v48 }
  0x60   : > { %996 = vst.msk [vmem:[%s2105_s22 + $0x28] sm:$0xff] %vm776_vm0, %v952_v45  ;;  %v926_v51 = vmul.f32 0.999, %v918_v49  ;;  %v974_v45 = vmul.f32 0.001, %v840_v8 }
  0x61   : > { %995 = vst.msk [vmem:[%s2105_s22 + $0x20] sm:$0xff] %vm776_vm0, %v951_v50  ;;  %v979_v50 = vadd.f32 %v975_v46, %v967_v43 }
  0x62   : > { %v950_v56 = vadd.f32 %v942_v52, %v926_v51  ;;  %v978_v49 = vadd.f32 %v974_v45, %v966_v42 }
  0x63   : > { %1004 = vst.msk [vmem:[%s2107_s24 + $0x18] sm:$0xff] %vm869_vm5, %v979_v50 }
  0x64   : > { %1053 = vmatpush.msra.mxu0 %v950_v56  ;;  %1003 = vst.msk [vmem:[%s2107_s24 + $0x10] sm:$0xff] %vm869_vm5, %v978_v49 }
  0x68   : > { %v917_v59 = vld [vmem:[%s2150_s10 + $0x10] sm:$0xff]  ;;  %v916_v62 = vld [vmem:[%s2150_s10 + $0x8] sm:$0xff] }
  0x69   : > { %v925_v60 = vmul.f32 0.999, %v917_v59  ;;  %994 = vst.msk [vmem:[%s2105_s22 + $0x18] sm:$0xff] %vm776_vm0, %v950_v56  ;;  %v924_v0 = vmul.f32 0.999, %v916_v62 }
  0x6b   : > { %v949_v2 = vadd.f32 %v941_v61, %v925_v60  ;;  %v948_v4 = vadd.f32 %v940_v1, %v924_v0 }
  0x6d   : > { %1054 = vmatpush.msra.mxu0 %v949_v2 }
  0x6f   : > { %1055 = vmatpush.msra.mxu0 %v948_v4 }
  0x70   : > { %v915_v3 = vld [vmem:[%s2150_s10] sm:$0xff] }
  0x71   : > { %v923_v5 = vmul.f32 0.999, %v915_v3  ;;  %993 = vst.msk [vmem:[%s2105_s22 + $0x10] sm:$0xff] %vm776_vm0, %v949_v2 }
  0x72   : > { %992 = vst.msk [vmem:[%s2105_s22 + $0x8] sm:$0xff] %vm776_vm0, %v948_v4 }
  0x73   : > { %v947_v9 = vadd.f32 %v939_v6, %v923_v5 }
  0x75   : > { %991 = vst.msk [vmem:[%s2105_s22] sm:$0xff] %vm776_vm0, %v947_v9  ;;  %1056 = vmatpush.msra.mxu0 %v947_v9 }
  0xcc   : > { %v797_v11 = vpop.f32.mrf.mxu2 }
  0xcd   : > { %v798_v12 = vadd.f32 %v1437_v10, %v797_v11 }
  0xcf   : > { %v800_v14 = vmax.f32 %v798_v12, 0.0 }
  0xd1   : > { %1339 = vmatmul.msk.f32.vlgmr.msra.gmra.mxu1 %vm813_vm1, %v800_v14  ;;  %v1031_v15 = vpop.f32.mrf.mxu3 }
  0xd2   : > { %v1032_v16 = vadd.f32 %v1031_v15, %v1009_v13 }
  0xd4   : > { %v1034_v17 = vmax.f32 %v1032_v16, 0.0 }
  0xd6   : > { %1342 = vmatmul.msk.f32.vlgmr.msra.gmra.mxu0 %vm813_vm1, %v1034_v17 }
 0x14e   : > { %v834_v26 = vpop.f32.mrf.mxu1 }
 0x14f   : > { %v835_v27 = vadd.f32 %v1438_v25, %v834_v26 }
 0x151   : > { %837 = vst.msk [vmem:[#allocation6] sm:$0xff] %vm776_vm0, %v835_v27  ;;  %1340 = vmatmul.msk.f32.vlgmr.msrb.gmra.mxu2 %vm776_vm0, %v835_v27  ;;  %v871_v29 = vmul.f32 %v835_v27, %v835_v27 }
 0x153   : > { %v872_v30 = vsel %vm776_vm0, %v871_v29, 0.0  ;;  %v1058_v31 = vpop.f32.mrf.mxu0 }
 0x154   : > { %873 = vadd.xlane.f32.xlu0 %v872_v30  ;;  %v1059_v32 = vadd.f32 %v1058_v31, %v1036_v28 }
 0x156   : > { %v1061_v33 = vmul.f32 %v1059_v32, %v1059_v32 }
 0x158   : > { %v1062_v34 = vsel %vm776_vm0, %v1061_v33, 0.0 }
 0x15c   : > { %1063 = vadd.xlane.f32.xlu0 %v1062_v34 }
 0x1c7   : > { %v874_v51 = vpop.xlane.xlu0 %873 }
 0x1c8   : > { %v875_v52 = vmax.f32 %v874_v51, 1e-24 }
 0x1ca   : > { %1440 = vrsqrt.f32 %v875_v52  ;;  %vm882_vm7 = vweird.f32 %v875_v52 }
 0x1cf   : > { %v1064_v53 = vpop.xlane.xlu0 %1063 }
 0x1d0   : > { %v1441_v54 = vpop.eup %1440  ;;  %v1065_v55 = vmax.f32 %v1064_v53, 1e-24 }
 0x1d1   : > { %v877_v56 = vmul.f32 %v1441_v54, %v875_v52  ;;  %vm883_vm6 = vweird.f32 %v1441_v54 }
 0x1d2   : > { %1442 = vrsqrt.f32 %v1065_v55  ;;  %vm884_vm8 = vmor %vm882_vm7, %vm883_vm6  ;;  %vm1072_vm11 = vweird.f32 %v1065_v55 }
 0x1d3   : > { %v878_v58 = vmul.f32 %v1441_v54, %v877_v56 }
 0x1d4   : > { %v866_v59 = vpop.f32.mrf.mxu2 }
 0x1d5   : > { %v879_v60 = vmul.f32 0.5, %v878_v58  ;;  %v867_v61 = vadd.f32 %v1439_v57, %v866_v59 }
 0x1d7   : > { %v880_v62 = vsub.f32 1.5, %v879_v60  ;;  %870 = vst.msk [vmem:[#allocation7] sm:$0xff] %vm869_vm5, %v867_v61 }
 0x1d8   : > { %v1443_v63 = vpop.eup %1442 }
 0x1d9   : > { %v1067_v0 = vmul.f32 %v1443_v63, %v1065_v55  ;;  %v881_v1 = vmul.f32 %v1441_v54, %v880_v62  ;;  %vm1073_vm10 = vweird.f32 %v1443_v63 }
 0x1da   : > { %vm1074_vm12 = vmor %vm1072_vm11, %vm1073_vm10 }
 0x1db   : > { %v1068_v2 = vmul.f32 %v1443_v63, %v1067_v0  ;;  %v885_v3 = vsel %vm884_vm8, %v1441_v54, %v881_v1 }
 0x1dc   : > { %v886_v4 = vmul.f32 %v885_v3, %v835_v27 }
 0x1dd   : > { %v1069_v5 = vmul.f32 0.5, %v1068_v2 }
 0x1de   : > { %v887_v6 = vpack.c.bf16 %v886_v4, %v886_v4 }
 0x1df   : > { %v1070_v7 = vsub.f32 1.5, %v1069_v5 }
 0x1e0   : > { %889 = vst.msk [vmem:[#allocation2] sm:$0xf] %vm888_vm9, %v887_v6 }
 0x1e1   : > { %v1071_v8 = vmul.f32 %v1443_v63, %v1070_v7 }
 0x1e3   : > { %v1075_v9 = vsel %vm1074_vm12, %v1443_v63, %v1071_v8 }
 0x1e4   : > { %v1076_v10 = vmul.f32 %v1075_v9, %v1059_v32 }
 0x1e6   : > { %v1078_v11 = vmul.f32 %v1076_v10, %v886_v4  ;;  %1077 = vst.msk [vmem:[#allocation9] sm:$0xff] %vm776_vm0, %v1076_v10 }
 0x1e8   : > { %v1079_v12 = vsel %vm776_vm0, %v1078_v11, 0.0 }
 0x1e9   : > { %1080 = vadd.xlane.f32.xlu1 %v1079_v12 }
 0x25c   : > { %v1081_v13 = vpop.xlane.xlu1 %1080 }
 0x25d   : > { %v1082_v14 = vmul.f32 14.285714, %v1081_v13 }
 0x25f   : > { %1084 = vst.msk [vmem:[%s2101_s18] sm:$0xff] %vm1083_vm13, %v1082_v14 }
 0x260 PF: > { %v1353_v15 = vld [vmem:[%s1806_s5 + $0x10] sm:$0xf]  ;;  %v1373_v16 = vld [vmem:[%s1806_s5 + $0x14] sm:$0xf0]  ;;  %v1372_v17 = vld [vmem:[%s1806_s5 + $0x14] sm:$0xf] }
 0x261   : > { %v1354_v18 = vor.u32 %v1373_v16, %v1353_v15  ;;  %v1355_v19 = vld [vmem:[%s1806_s5 + $0x18] sm:$0xf0]  ;;  %v1345_v20 = vld [vmem:[%s1806_s5] sm:$0xf]  ;;  %v1371_v21 = vld [vmem:[%s1806_s5 + $0x4] sm:$0xf0] }
 0x262   : > { %v1358_v22 = vor.u32 %v1372_v17, %v1355_v19  ;;  %v1370_v23 = vld [vmem:[%s1806_s5 + $0x4] sm:$0xf]  ;;  %v1347_v24 = vld [vmem:[%s1806_s5 + $0x8] sm:$0xf0]  ;;  %v1346_v25 = vor.u32 %v1371_v21, %v1345_v20  ;;  %v1085_v27 = vld [vmem:[#allocation2] sm:$0xf] }
 0x263   : > { %1120 = vmatpush.bf16.msra.mxu0 %v1354_v18  ;;  %v1350_v26 = vor.u32 %v1370_v23, %v1347_v24  ;;  %vm1110_vm14 = vcmask 261120   ;;  %p1393_p7 = scmp.eq.s32.totalorder %s1757_s7, 3  ;;  %s1605_s16 = smov [#allocation7]  }
 0x264   : > { %1133 = vmatpush.bf16.msra.mxu1 %v1358_v22  ;;  %s1167_s6 = sshll.u32 %s1605_s16, 4  ;;  %s2157_s30 = sld [smem:[#allocation29_spill]]  ;;  %s1168_s6 = int_to_ptr.vmem [resolvable:$true] %s1167_s6 }
 0x265   : > { %s2158_s1 = sld [smem:[#allocation28_spill]]  ;;  %s1606_s0 = smov [#allocation6]  }
 0x266   : > { %s1155_s4 = sshll.u32 %s1606_s0, 4  ;;  %s1607_s16 = smov [#allocation9]   ;;  %s1156_s4 = int_to_ptr.vmem [resolvable:$true] %s1155_s4 }
 0x267   : > { %1121 = vmatpush.bf16.msra.mxu0 %v1346_v25  ;;  %s1179_s15 = sshll.u32 %s1607_s16, 4  ;;  %s2159_s10 = sld [smem:[#allocation30_spill]]  ;;  %s1180_s15 = int_to_ptr.vmem [resolvable:$true] %s1179_s15 }
 0x268   : > { %1134 = vmatpush.bf16.msra.mxu1 %v1350_v26 }
 0x26a   : > { %1359 = vmatmul.msk.bf16.vlgmr.msra.gmra.mxu0 %vm1110_vm14, %v1085_v27  ;;  %s1169_s5 = sshll.u32 %s2157_s30, 4  ;;  %s1170_s5 = int_to_ptr.hbm [resolvable:$true] %s1169_s5 }
 0x26b   : > { %1360 = vmatmul.msk.bf16.vlgmr.msra.gmra.mxu1 %vm1110_vm14, %v1085_v27  ;;  %1379 = dma.vmem_to_hbm [thread:$0]  (%p1393_p7), %s1168_s6, 128, %s1170_s5, [#allocation8]  }
 0x26c   : > { %s1157_s9 = sshll.u32 %s2158_s1, 4  ;;  %s1158_s9 = int_to_ptr.hbm [resolvable:$true] %s1157_s9 }
 0x26d   : > { %1377 = dma.vmem_to_hbm [thread:$0]  (%p1393_p7), %s1156_s4, 128, %s1158_s9, [#allocation5]  }
 0x26e   : > { %s1181_s11 = sshll.u32 %s2159_s10, 4  ;;  %s1182_s11 = int_to_ptr.hbm [resolvable:$true] %s1181_s11 }
 0x26f   : > { %1381 = dma.vmem_to_hbm [thread:$0]  (%p1393_p7), %s1180_s15, 128, %s1182_s11, [#allocation8]  }
 0x2e7   : > { %v1123_v28 = vpop.f32.mrf.mxu0 }
 0x2e8   : > { %v1140_v29 = vmul.f32 14.285714, %v1123_v28  ;;  %v1136_v30 = vpop.f32.mrf.mxu1 }
 0x2e9   : > { %v1141_v31 = vmul.f32 14.285714, %v1136_v30 }
 0x2ea   : > { %1142 = vst [vmem:[%s1816_s3] sm:$0xff] %v1140_v29 }
 0x2eb   : > { %1143 = vst [vmem:[%s1816_s3 + $0x8] sm:$0xff] %v1141_v31 }
 0x2ef   : > { %v1125_v32 = vpop.f32.mrf.mxu0 }
 0x2f0   : > { %v1138_v33 = vpop.f32.mrf.mxu1 }
 0x2f1   : > { %1579 = dma.done.wait (%p1393_p7), [#allocation5], 128  }
 0x2f2   : > { %1581 = vsyncadd (%p1393_p7), [#allocation5], 4294967168 }
 0x2f3   : > { %1583 = dma.done.wait (%p1393_p7), [#allocation8], 256  }
 0x2f4   : > { %1585 = vsyncadd (%p1393_p7), [#allocation8], 4294967040 }
 0x2f5 PF: > { %s2160_s30 = sld [smem:[#allocation14_spill]]  ;;  %s2163_s29 = smov %s1592_s2 }
 0x2f6   : > { %s2161_s10 = sld [smem:[#allocation13_spill]] }
 0x2f7   : > { %s2162_s6 = sld [smem:[#allocation15_spill]] }
 0x2fb   : > { %p38_p9 = scmp.ge.s32.totalorder %s2160_s30, 6  }
 0x2fc   : > { %s2164_s2 = smov %s2161_s10 }
 0x2fd   :  { %40 = sbr.rel (!%p38_p9) target bundleno = 21 (0x15), region = 205 }
 0x302   :  { %1259 = vsyncpa [#allocation4], 1 }
 0x303   :  { %1261 = vsyncpa [#allocation4 + $0x1], 1 }
 0x304   :  { %1262 = vsyncpa [#allocation5], 1 }
 0x305   :  { %1264 = vsyncpa [#allocation5 + $0x1], 1 }
 0x306   :  { %1265 = vsyncpa [#allocation8], 1 }

</bundles_post_ra>
